<compile_context>
chip_gen: v7x
topology: tpu7x:2x2x1
jax: 0.10.0
libtpu: 0.0.40
codegen_flags: <defaults>
</compile_context>

<pallas_src>
import functools

import jax
import jax.numpy as jnp
from jax.experimental import pallas as pl
from jax.experimental.pallas import tpu as pltpu

SMOOTH = 1e-5
_DEFAULT_BLOCK_BYTES = 2 * 1024 * 1024   # per-input DMA block target
_VMEM_LIMIT_BYTES = 48 * 1024 * 1024     # explicit scoped-VMEM budget (fits v7x 64 MiB)


def _choose_row_tile(rows, cols, c, itemsize, target_bytes):
    """Largest divisor of `rows` that is a multiple of 8 and keeps the net
    block (c * tr * cols * itemsize) under `target_bytes`.  Falls back to the
    smallest multiple-of-8 divisor, then to the full extent (a block dim equal
    to the array dim is exempt from the (8,128) rule).  Because tr always
    divides rows exactly, no HBM padding is ever needed."""
    best = None
    for tr in range(8, rows + 1, 8):
        if rows % tr == 0 and c * tr * cols * itemsize <= target_bytes:
            best = tr
    if best is None:
        for tr in range(8, rows + 1, 8):
            if rows % tr == 0:
                best = tr
                break
    return best if best is not None else rows


def _gdice_kernel(net_ref, gt_ref, out_ref,
                  sum_y_ref, sum_net_ref, sum_prod_ref,
                  *, num_classes, fuse_softmax, gt_is_labels, smooth):
    # net_ref: (1, C, TR, cols) VMEM block, native dtype (upcast here).
    # gt_ref : (1, C, TR, cols) one-hot block, or (1, 1, TR, cols) int32 labels.
    # out_ref: (1, 8, 128) lane-dense scalar block (value broadcast).
    # sum_*_ref: (C, cols) f32 accumulators — lane reduce deferred to finalize.
    k = pl.program_id(1)

    @pl.when(k == 0)
    def _init():
        sum_y_ref[...] = jnp.zeros_like(sum_y_ref)
        sum_net_ref[...] = jnp.zeros_like(sum_net_ref)
        sum_prod_ref[...] = jnp.zeros_like(sum_prod_ref)

    net = net_ref[...].astype(jnp.float32)          # f32 upcast in VMEM, not HBM

    if fuse_softmax:
        m = jnp.max(net, axis=1, keepdims=True)
        e = jnp.exp(net - m)
        denom = jnp.sum(e, axis=1, keepdims=True)
        # approx reciprocal -> EUP slot; frees the VALU (binds on v5e).
        net = e * pl.reciprocal(denom, approx=True)

    if gt_is_labels:
        lab = gt_ref[...]                           # (1, 1, TR, cols) int32
        # One-hot built in VMEM from the label map (per-channel compares).
        y = jnp.concatenate(
            [(lab == c).astype(jnp.float32) for c in range(num_classes)],
            axis=1)                                 # (1, C, TR, cols)
    else:
        y = gt_ref[...].astype(jnp.float32)

    # Hot-loop reductions only collapse the row (sublane) axis; the expensive
    # 128-lane XLU reduce happens once, in the finalize below.
    sum_y_ref[...] += jnp.sum(y, axis=(0, 2))
    sum_net_ref[...] += jnp.sum(net, axis=(0, 2))
    sum_prod_ref[...] += jnp.sum(net * y, axis=(0, 2))

    @pl.when(k == pl.num_programs(1) - 1)
    def _finalize():
        sy = jnp.sum(sum_y_ref[...], axis=-1, keepdims=True)      # (C, 1)
        sn = jnp.sum(sum_net_ref[...], axis=-1, keepdims=True)
        sp = jnp.sum(sum_prod_ref[...], axis=-1, keepdims=True)
        w = 1.0 / (sy + 1e-10) ** 2
        num = jnp.sum(w * sp) + smooth
        den = jnp.sum(w * (sn + sy)) + smooth
        loss = 1.0 - 2.0 * num / den
        out_ref[...] = jnp.full(out_ref.shape, loss, dtype=jnp.float32)


def gdice_loss(net_output, gt, apply_nonlin=None, smooth=SMOOTH,
               target_block_bytes=_DEFAULT_BLOCK_BYTES):
    """Generalized Dice loss, per-batch vector of shape (B,), float32
    (matches the PyTorch module, which returns the per-batch gdc vector).

    net_output: (B, C, H, W), any float dtype (kept native in HBM).
    gt: either one-hot with the same shape, or an integer label map of shape
        (B, H, W) / (B, 1, H, W) — the one-hot is then built *inside* the
        kernel (no one-hot tensor ever touches HBM).
    apply_nonlin: None, the string "softmax" (fused in-kernel), or a callable.
    """
    B, C, H, W = net_output.shape

    fuse_softmax = (apply_nonlin == "softmax")
    if (apply_nonlin is not None) and not fuse_softmax:
        # TODO(synk): arbitrary callables cost an extra HBM round trip; pass
        # apply_nonlin="softmax" to get the fused in-kernel path.
        net_output = apply_nonlin(net_output)

    gt_is_labels = (gt.shape != net_output.shape)
    if gt_is_labels:
        labels = gt
        if labels.ndim == net_output.ndim:           # (B, 1, H, W)
            labels = jnp.squeeze(labels, axis=1)
        labels = labels.astype(jnp.int32)            # (B, H, W)

    HW = H * W
    if HW % 128 == 0:
        # Lane-dense flattened view: free bitcast, last dim is a full 128-lane row.
        rows, cols = HW // 128, 128
        net_in = jnp.reshape(net_output, (B, C, rows, cols))
        if gt_is_labels:
            gt_in = jnp.reshape(labels, (B, 1, rows, cols))
        else:
            gt_in = jnp.reshape(gt, (B, C, rows, cols))
    else:
        # TODO(synk): ragged HW; tile over H on the native layout (no copy).
        # Lane-sparse when W < 128, but avoids any padded HBM materialization.
        rows, cols = H, W
        net_in = net_output
        gt_in = labels[:, None, :, :] if gt_is_labels else gt

    itemsize = jnp.dtype(net_output.dtype).itemsize
    tr = _choose_row_tile(rows, cols, C, itemsize, target_block_bytes)
    num_tiles = rows // tr
    gt_c = 1 if gt_is_labels else C

    kernel = functools.partial(
        _gdice_kernel, num_classes=C, fuse_softmax=fuse_softmax,
        gt_is_labels=gt_is_labels, smooth=smooth)

    # TODO(synk): on v7x (2 TensorCores), B is the only parallel axis; a
    # spatial 2-way split with a cross-core combine would help when B is tiny.
    out = pl.pallas_call(
        kernel,
        out_shape=jax.ShapeDtypeStruct((B, 8, 128), jnp.float32),
        grid_spec=pltpu.PrefetchScalarGridSpec(
            num_scalar_prefetch=0,
            grid=(B, num_tiles),
            in_specs=[
                pl.BlockSpec((1, C, tr, cols), lambda b, k: (b, 0, k, 0)),
                pl.BlockSpec((1, gt_c, tr, cols), lambda b, k: (b, 0, k, 0)),
            ],
            out_specs=pl.BlockSpec((1, 8, 128), lambda b, k: (b, 0, 0)),
            scratch_shapes=[
                pltpu.VMEM((C, cols), jnp.float32),   # sum_y
                pltpu.VMEM((C, cols), jnp.float32),   # sum_net
                pltpu.VMEM((C, cols), jnp.float32),   # sum_prod
            ],
        ),
        compiler_params=pltpu.CompilerParams(
            dimension_semantics=("parallel", "arbitrary"),
            vmem_limit_bytes=_VMEM_LIMIT_BYTES),
    )(net_in, gt_in)

    return out[:, 0, 0]


def _reference_gdice(net_output, gt, smooth=SMOOTH):
    # Pure-JAX reference mirroring the PyTorch forward (same-shape gt branch).
    y = gt.astype(jnp.float32)
    net = net_output.astype(jnp.float32)
    sum_y = jnp.einsum('bcxy->bc', y)
    w = 1.0 / (sum_y + 1e-10) ** 2
    intersection = w * jnp.einsum('bcxy,bcxy->bc', net, y)
    union = w * (jnp.einsum('bcxy->bc', net) + sum_y)
    return 1.0 - 2.0 * (jnp.sum(intersection, -1) + smooth) / (jnp.sum(union, -1) + smooth)


if __name__ == "__main__":
    key = jax.random.PRNGKey(0)
    B, C, H, W = 2, 4, 16, 16

    k1, k2, k3 = jax.random.split(key, 3)
    logits = jax.random.normal(k1, (B, C, H, W), jnp.float32)
    labels = jax.random.randint(k2, (B, H, W), 0, C)
    gt = jnp.transpose(jax.nn.one_hot(labels, C, dtype=jnp.float32), (0, 3, 1, 2))

    # Case 1: module default (apply_nonlin=None), probabilities precomputed, f32,
    # one-hot gt of the same shape.
    probs = jax.nn.softmax(logits, axis=1)
    loss1 = jax.block_until_ready(gdice_loss(probs, gt))
    ref1 = _reference_gdice(probs, gt)
    assert loss1.shape == (B,)
    assert jnp.allclose(loss1, ref1, atol=1e-5, rtol=1e-5), (loss1, ref1)

    # Case 2: bf16 logits kept native in HBM, softmax fused inside the kernel,
    # gt passed as an integer label map (one-hot built in-kernel).
    logits_bf16 = logits.astype(jnp.bfloat16)
    loss2 = jax.block_until_ready(
        gdice_loss(logits_bf16, labels, apply_nonlin="softmax"))
    ref2 = _reference_gdice(
        jax.nn.softmax(logits_bf16.astype(jnp.float32), axis=1), gt)
    assert loss2.shape == (B,)
    # approx-reciprocal softmax denom perturbs results ~1e-3 relative.
    assert jnp.allclose(loss2, ref2, atol=5e-3, rtol=5e-3), (loss2, ref2)

    # Case 3: force multi-tile spatial accumulation (tiny block budget) to
    # exercise the init / accumulate / finalize path across grid steps.
    H3 = W3 = 64
    k4, k5 = jax.random.split(k3)
    probs3 = jax.nn.softmax(jax.random.normal(k4, (B, C, H3, W3), jnp.float32), axis=1)
    labels3 = jax.random.randint(k5, (B, H3, W3), 0, C)
    gt3 = jnp.transpose(jax.nn.one_hot(labels3, C, dtype=jnp.float32), (0, 3, 1, 2))
    loss3 = jax.block_until_ready(
        gdice_loss(probs3, gt3, target_block_bytes=8 * 1024))
    ref3 = _reference_gdice(probs3, gt3)
    assert loss3.shape == (B,)
    assert jnp.allclose(loss3, ref3, atol=1e-4, rtol=1e-4), (loss3, ref3)

    print("KERNEL_OK")
</pallas_src>

<mosaic_0001>
module attributes {stable_mosaic.version = 11 : i64} {
  func.func @_gdice_kernel(%arg0: i32, %arg1: i32, %arg2: memref<1x4x2x128xf32, #tpu.memory_space<vmem>>, %arg3: memref<1x4x2x128xf32, #tpu.memory_space<vmem>>, %arg4: memref<1x8x128xf32, #tpu.memory_space<vmem>>, %arg5: memref<4x128xf32, #tpu.memory_space<vmem>>, %arg6: memref<4x128xf32, #tpu.memory_space<vmem>>, %arg7: memref<4x128xf32, #tpu.memory_space<vmem>>) attributes {dimension_semantics = [#tpu.dimension_semantics<parallel>, #tpu.dimension_semantics<arbitrary>], iteration_bounds = array<i64: 2, 1>, scalar_prefetch = 0 : i64, scratch_operands = 3 : i64, tpu.core_type = #tpu.core_type<tc>, window_params = [{transform_indices = @transform_0, window_bounds = array<i64: 1, 4, 2, 128>}, {transform_indices = @transform_1, window_bounds = array<i64: 1, 4, 2, 128>}, {transform_indices = @transform_2, window_bounds = array<i64: 1, 8, 128>}]} {
    %c0_i32 = arith.constant 0 : i32
    %0 = arith.cmpi eq, %arg1, %c0_i32 : i32
    %1 = arith.extui %0 : i1 to i32
    %c0_i32_0 = arith.constant 0 : i32
    %2 = arith.cmpi ne, %1, %c0_i32_0 : i32
    scf.if %2 {
      %cst_24 = arith.constant 0.000000e+00 : f32
      %21 = vector.broadcast %cst_24 : f32 to vector<4x128xf32>
      %c0_25 = arith.constant 0 : index
      %c0_26 = arith.constant 0 : index
      %22 = vector.load %arg5[%c0_25, %c0_26] : memref<4x128xf32, #tpu.memory_space<vmem>>, vector<4x128xf32>
      tpu.vector_store %arg5[%c0_25, %c0_26], %21 {strides = array<i32>} : memref<4x128xf32, #tpu.memory_space<vmem>>, vector<4x128xf32>,
      %cst_27 = arith.constant 0.000000e+00 : f32
      %23 = vector.broadcast %cst_27 : f32 to vector<4x128xf32>
      %c0_28 = arith.constant 0 : index
      %c0_29 = arith.constant 0 : index
      %24 = vector.load %arg6[%c0_28, %c0_29] : memref<4x128xf32, #tpu.memory_space<vmem>>, vector<4x128xf32>
      tpu.vector_store %arg6[%c0_28, %c0_29], %23 {strides = array<i32>} : memref<4x128xf32, #tpu.memory_space<vmem>>, vector<4x128xf32>,
      %cst_30 = arith.constant 0.000000e+00 : f32
      %25 = vector.broadcast %cst_30 : f32 to vector<4x128xf32>
      %c0_31 = arith.constant 0 : index
      %c0_32 = arith.constant 0 : index
      %26 = vector.load %arg7[%c0_31, %c0_32] : memref<4x128xf32, #tpu.memory_space<vmem>>, vector<4x128xf32>
      tpu.vector_store %arg7[%c0_31, %c0_32], %25 {strides = array<i32>} : memref<4x128xf32, #tpu.memory_space<vmem>>, vector<4x128xf32>,
    } else {
    }
    %c0 = arith.constant 0 : index
    %c0_1 = arith.constant 0 : index
    %c0_2 = arith.constant 0 : index
    %c0_3 = arith.constant 0 : index
    %3 = vector.load %arg2[%c0, %c0_1, %c0_2, %c0_3] : memref<1x4x2x128xf32, #tpu.memory_space<vmem>>, vector<1x4x2x128xf32>
    %c0_4 = arith.constant 0 : index
    %c0_5 = arith.constant 0 : index
    %c0_6 = arith.constant 0 : index
    %c0_7 = arith.constant 0 : index
    %4 = vector.load %arg3[%c0_4, %c0_5, %c0_6, %c0_7] : memref<1x4x2x128xf32, #tpu.memory_space<vmem>>, vector<1x4x2x128xf32>
    %c0_8 = arith.constant 0 : index
    %c0_9 = arith.constant 0 : index
    %5 = vector.load %arg5[%c0_8, %c0_9] : memref<4x128xf32, #tpu.memory_space<vmem>>, vector<4x128xf32>
    %cst = arith.constant dense<0.000000e+00> : vector<4x128xf32>
    %6 = vector.multi_reduction <add>, %4, %cst [0, 2] : vector<1x4x2x128xf32> to vector<4x128xf32>
    %7 = arith.addf %5, %6 : vector<4x128xf32>
    %c0_10 = arith.constant 0 : index
    %c0_11 = arith.constant 0 : index
    %8 = vector.load %arg5[%c0_10, %c0_11] : memref<4x128xf32, #tpu.memory_space<vmem>>, vector<4x128xf32>
    tpu.vector_store %arg5[%c0_10, %c0_11], %7 {strides = array<i32>} : memref<4x128xf32, #tpu.memory_space<vmem>>, vector<4x128xf32>,
    %c0_12 = arith.constant 0 : index
    %c0_13 = arith.constant 0 : index
    %9 = vector.load %arg6[%c0_12, %c0_13] : memref<4x128xf32, #tpu.memory_space<vmem>>, vector<4x128xf32>
    %cst_14 = arith.constant dense<0.000000e+00> : vector<4x128xf32>
    %10 = vector.multi_reduction <add>, %3, %cst_14 [0, 2] : vector<1x4x2x128xf32> to vector<4x128xf32>
    %11 = arith.addf %9, %10 : vector<4x128xf32>
    %c0_15 = arith.constant 0 : index
    %c0_16 = arith.constant 0 : index
    %12 = vector.load %arg6[%c0_15, %c0_16] : memref<4x128xf32, #tpu.memory_space<vmem>>, vector<4x128xf32>
    tpu.vector_store %arg6[%c0_15, %c0_16], %11 {strides = array<i32>} : memref<4x128xf32, #tpu.memory_space<vmem>>, vector<4x128xf32>,
    %c0_17 = arith.constant 0 : index
    %c0_18 = arith.constant 0 : index
    %13 = vector.load %arg7[%c0_17, %c0_18] : memref<4x128xf32, #tpu.memory_space<vmem>>, vector<4x128xf32>
    %14 = arith.mulf %3, %4 : vector<1x4x2x128xf32>
    %cst_19 = arith.constant dense<0.000000e+00> : vector<4x128xf32>
    %15 = vector.multi_reduction <add>, %14, %cst_19 [0, 2] : vector<1x4x2x128xf32> to vector<4x128xf32>
    %16 = arith.addf %13, %15 : vector<4x128xf32>
    %c0_20 = arith.constant 0 : index
    %c0_21 = arith.constant 0 : index
    %17 = vector.load %arg7[%c0_20, %c0_21] : memref<4x128xf32, #tpu.memory_space<vmem>>, vector<4x128xf32>
    tpu.vector_store %arg7[%c0_20, %c0_21], %16 {strides = array<i32>} : memref<4x128xf32, #tpu.memory_space<vmem>>, vector<4x128xf32>,
    %c0_i32_22 = arith.constant 0 : i32
    %18 = arith.cmpi eq, %arg1, %c0_i32_22 : i32
    %19 = arith.extui %18 : i1 to i32
    %c0_i32_23 = arith.constant 0 : i32
    %20 = arith.cmpi ne, %19, %c0_i32_23 : i32
    scf.if %20 {
      %c0_24 = arith.constant 0 : index
      %c0_25 = arith.constant 0 : index
      %21 = vector.load %arg5[%c0_24, %c0_25] : memref<4x128xf32, #tpu.memory_space<vmem>>, vector<4x128xf32>
      %cst_26 = arith.constant dense<0.000000e+00> : vector<4xf32>
      %22 = vector.multi_reduction <add>, %21, %cst_26 [1] : vector<4x128xf32> to vector<4xf32>
      %23 = vector.shape_cast %22 : vector<4xf32> to vector<4x1xf32>
      %c0_27 = arith.constant 0 : index
      %c0_28 = arith.constant 0 : index
      %24 = vector.load %arg6[%c0_27, %c0_28] : memref<4x128xf32, #tpu.memory_space<vmem>>, vector<4x128xf32>
      %cst_29 = arith.constant dense<0.000000e+00> : vector<4xf32>
      %25 = vector.multi_reduction <add>, %24, %cst_29 [1] : vector<4x128xf32> to vector<4xf32>
      %26 = vector.shape_cast %25 : vector<4xf32> to vector<4x1xf32>
      %c0_30 = arith.constant 0 : index
      %c0_31 = arith.constant 0 : index
      %27 = vector.load %arg7[%c0_30, %c0_31] : memref<4x128xf32, #tpu.memory_space<vmem>>, vector<4x128xf32>
      %cst_32 = arith.constant dense<0.000000e+00> : vector<4xf32>
      %28 = vector.multi_reduction <add>, %27, %cst_32 [1] : vector<4x128xf32> to vector<4xf32>
      %29 = vector.shape_cast %28 : vector<4xf32> to vector<4x1xf32>
      %cst_33 = arith.constant 1.000000e-10 : f32
      %30 = vector.broadcast %cst_33 : f32 to vector<4x1xf32>
      %31 = arith.addf %23, %30 : vector<4x1xf32>
      %32 = arith.mulf %31, %31 : vector<4x1xf32>
      %cst_34 = arith.constant 1.000000e+00 : f32
      %33 = vector.broadcast %cst_34 : f32 to vector<4x1xf32>
      %34 = arith.divf %33, %32 : vector<4x1xf32>
      %35 = arith.mulf %34, %29 : vector<4x1xf32>
      %36 = vector.shape_cast %35 : vector<4x1xf32> to vector<1x4x1xf32>
      %cst_35 = arith.constant dense<0.000000e+00> : vector<1xf32>
      %37 = vector.multi_reduction <add>, %36, %cst_35 [1, 2] : vector<1x4x1xf32> to vector<1xf32>
      %38 = vector.shape_cast %37 : vector<1xf32> to vector<1x1x1xf32>
      %39 = vector.extract %38[0, 0, 0] : f32 from vector<1x1x1xf32>
      %cst_36 = arith.constant 9.99999974E-6 : f32
      %40 = arith.addf %39, %cst_36 : f32
      %41 = arith.addf %26, %23 : vector<4x1xf32>
      %42 = arith.mulf %34, %41 : vector<4x1xf32>
      %43 = vector.shape_cast %42 : vector<4x1xf32> to vector<1x4x1xf32>
      %cst_37 = arith.constant dense<0.000000e+00> : vector<1xf32>
      %44 = vector.multi_reduction <add>, %43, %cst_37 [1, 2] : vector<1x4x1xf32> to vector<1xf32>
      %45 = vector.shape_cast %44 : vector<1xf32> to vector<1x1x1xf32>
      %46 = vector.extract %45[0, 0, 0] : f32 from vector<1x1x1xf32>
      %cst_38 = arith.constant 9.99999974E-6 : f32
      %47 = arith.addf %46, %cst_38 : f32
      %cst_39 = arith.constant 2.000000e+00 : f32
      %48 = arith.mulf %cst_39, %40 : f32
      %49 = arith.divf %48, %47 : f32
      %cst_40 = arith.constant 1.000000e+00 : f32
      %50 = arith.subf %cst_40, %49 : f32
      %51 = vector.broadcast %50 : f32 to vector<1x8x128xf32>
      %c0_41 = arith.constant 0 : index
      %c0_42 = arith.constant 0 : index
      %c0_43 = arith.constant 0 : index
      %52 = vector.load %arg4[%c0_41, %c0_42, %c0_43] : memref<1x8x128xf32, #tpu.memory_space<vmem>>, vector<1x8x128xf32>
      tpu.vector_store %arg4[%c0_41, %c0_42, %c0_43], %51 {strides = array<i32>} : memref<1x8x128xf32, #tpu.memory_space<vmem>>, vector<1x8x128xf32>,
    } else {
    }
    return
  }
  func.func @transform_0(%arg0: i32, %arg1: i32) -> (i32, i32, i32, i32) {
    %c0_i32 = arith.constant 0 : i32
    %c0_i32_0 = arith.constant 0 : i32
    %c0_i32_1 = arith.constant 0 : i32
    return %arg0, %c0_i32, %arg1, %c0_i32_0 : i32, i32, i32, i32
  }
  func.func @transform_1(%arg0: i32, %arg1: i32) -> (i32, i32, i32, i32) {
    %c0_i32 = arith.constant 0 : i32
    %c0_i32_0 = arith.constant 0 : i32
    %c0_i32_1 = arith.constant 0 : i32
    return %arg0, %c0_i32, %arg1, %c0_i32_0 : i32, i32, i32, i32
  }
  func.func @transform_2(%arg0: i32, %arg1: i32) -> (i32, i32, i32) {
    %c0_i32 = arith.constant 0 : i32
    %c0_i32_0 = arith.constant 0 : i32
    %c0_i32_1 = arith.constant 0 : i32
    return %arg0, %c0_i32, %c0_i32_0 : i32, i32, i32
  }
}

</mosaic_0001>

<bundles_post_ra>
// kernel: tpu_custom_call.1
= control target key start
LH: loop header
LB: loop body
LE: loop exit
PB: predicated region body
PF: predicated region fallthrough
CT: control target
= control target key end

     0   :  { %7 = vsyncpa [#allocation6], 0  ;;  %s1083_s0 = inlined_call_operand.hbm [shape: f32[2,4,2,128], index: 0, kind: input, shape index: {}]   ;;  %s1084_s1 = inlined_call_operand.hbm [shape: f32[2,4,2,128], index: 1, kind: input, shape index: {}]   ;;  %s1085_s2 = inlined_call_operand.hbm [shape: f32[2,8,128], index: 2, kind: output, shape index: {}]  }
   0x1   :  { %9 = vsyncpa [#allocation6 + $0x1], 0 }
   0x2   :  { %10 = vsyncpa [#allocation9], 0 }
   0x3   :  { %12 = vsyncpa [#allocation9 + $0x1], 0 }
   0x4   :  { %13 = vsyncpa [#allocation7], 0 }
   0x5   :  { %15 = vsyncpa [#allocation7 + $0x1], 0  ;;  %s802_s9 = smov 0   ;;  %s804_s10 = smov 0  }
   0x6   :  { %s806_s11 = smov 0   ;;  %s808_s12 = smov 0  }
   0x7   :  { %s810_s13 = smov 0   ;;  %s812_s14 = smov 0  }
   0x8 LB: > { %s533_s15 = sadd.s32 4294967295, %s779_s14   ;;  %s534_s16 = sadd.s32 4294967294, %s779_s14   ;;  %s779_s14 = sphi %s812_s14, %s21_s14   ;;  %s775_s13 = sphi %s810_s13, %s1103_s13   ;;  %s771_s12 = sphi %s808_s12, %s1102_s12   ;;  %s767_s11 = sphi %s806_s11, %s1101_s11   ;;  %s763_s10 = sphi %s804_s10, %s1100_s10   ;;  %s759_s9 = sphi %s802_s9, %s1099_s9  }
   0x9   : > { %s33_s17 = sadd.s32 1, %s775_s13  ;;  %s42_s18 = sadd.s32 1, %s767_s11 }
   0xa   : > { %p35_p0 = scmp.ge.s32.totalorder %s33_s17, 2  ;;  %p49_p1 = scmp.ne.s32.totalorder %s767_s11, %s763_s10 }
   0xb   : > { %p50_p2 = scmp.eq.s32.totalorder %s779_s14, 0  ;;  %p55_p3 = scmp.ne.s32.totalorder %s763_s10, %s759_s9 }
   0xc   : > { %s1105_s17 = smov (%p35_p0, %s33_s17), 0  ;;  %p56_p5 = scmp.eq.s32.totalorder %s533_s15, 0 }
   0xd   : > { %p843_p4 = por %p50_p2, %p49_p1  ;;  %s37_s20 = ssub.s32 %s775_s13, %s1105_s17 }
   0xe   : > { %p107_p6 = scmp.eq.s32.totalorder %s533_s15, 1  ;;  %p40_p7 = scmp.eq.s32.totalorder %s37_s20, 0 }
   0xf   : > { %p849_p8 = por %p56_p5, %p55_p3  ;;  %p113_p10 = scmp.eq.s32.totalorder %s534_s16, 1 }
  0x10   : > { %p853_p9 = por %p107_p6, %p49_p1  ;;  %p576_p13 = scmp.lt.s32.totalorder %s779_s14, 2 }
  0x11   : > { %s1089_s21 = scalar_select %p849_p8, 1, 0 }
  0x12   : > { %s1090_s22 = scalar_select %p853_p9, 1, 0 }
  0x13   : > { %s858_s23 = scalar_select %p40_p7, %s767_s11, %s42_s18  }
  0x14   : > { %p860_p11 = por %p113_p10, %p55_p3  ;;  %s867_s25 = sand.u32 1, %s767_s11  }
  0x15   : > { %s537_s26 = sshll.u32 %s867_s25, 3  ;;  %s551_s27 = sshll.u32 %s775_s13, 7 }
  0x16   : > { %s1091_s24 = scalar_select %p860_p11, 1, 0 }
  0x17   : > { %s876_s30 = scalar_lea.hbm %s1083_s0, %s551_s27  ;;  %s137_s3 = scalar_lea.vmem [#allocation5], %s537_s26 }
  0x18   : > { %s145_s4 = sshll.u32 %s137_s3, 4  ;;  %p884_p0 = pnand %p576_p13, %p843_p4  ;;  %s880_s4 = int_to_ptr.vmem [resolvable:$true] %s145_s4 }
  0x19   : > { %s134_s6 = scalar_lea.sflag [#allocation6], %s867_s25  ;;  %s633_s7 = scalar_lea.hbm %s876_s30, 128 }
  0x1a   : > { %p634_p2 = scmp.ne.s32.totalorder %s876_s30, %s633_s7  ;;  %p635_p3 = pneg %p884_p0 }
  0x1b   : > { %s638_s16 = scalar_lea.hbm %s1083_s0, 256  ;;  %p639_p4 = scmp.lt.u32.totalorder %s876_s30, %s1083_s0 }
  0x1c   : > { %p636_p5 = pnand %p635_p3, %p634_p2  ;;  %p640_p7 = scmp.lt.u32.totalorder %s638_s16, %s633_s7 }
  0x1d   : > { %p642_p13 = scmp.lt.u32.totalorder %s633_s7, %s876_s30 }
  0x1e   : > { %p637_p6 = pneg %p636_p5  ;;  %p641_p10 = por %p640_p7, %p639_p4 }
  0x20   : > { %p643_p12 = por %p642_p13, %p641_p10 }
  0x22   : > { %p644_p1 = pnand %p643_p12, %p637_p6 }
  0x24   : > { %647 = shalt.err (!%p644_p1)
}
  0x25   : > { %s648_s20 = scalar_lea.vmem %s880_s4, 128  ;;  %s781_s28 = smov [#allocation5]  }
  0x26   : > { %p649_p2 = scmp.ne.s32.totalorder %s880_s4, %s648_s20  ;;  %s653_s29 = sshll.u32 %s781_s28, 4  ;;  %s654_s29 = int_to_ptr.vmem [resolvable:$false] %s653_s29 }
  0x27   : > { %s655_s3 = scalar_lea.vmem %s654_s29, 256  ;;  %p656_p9 = scmp.lt.s32.totalorder %s880_s4, %s654_s29 }
  0x28   : > { %p651_p5 = pnand %p649_p2, %p635_p3  ;;  %p657_p4 = scmp.lt.s32.totalorder %s655_s3, %s648_s20 }
  0x2a   : > { %p652_p11 = pneg %p651_p5  ;;  %p658_p7 = por %p657_p4, %p656_p9 }
  0x2c   : > { %p659_p10 = pnand %p658_p7, %p652_p11 }
  0x2e   : > { %662 = shalt.err (!%p659_p10)
}
  0x2f   : > { %s782_s7 = smov 32   ;;  %s783_s8 = smov 2  }
  0x30   : > { %568 = dma.hbm_to_vmem [thread:$0]  (!%p884_p0), %s876_s30, 128, %s880_s4, %s134_s6, %s782_s7, %s782_s7, %s783_s8  }
  0x31   : > { %p175_p9 = scmp.lt.s32.totalorder %s779_s14, 3  ;;  %s926_s18 = scalar_lea.hbm %s1084_s1, %s551_s27 }
  0x32   : > { %p1093_p11 = scmp.ge.s32.totalorder %s779_s14, 1  ;;  %s159_s20 = scalar_lea.vmem [#allocation8], %s537_s26 }
  0x33   : > { %s167_s28 = sshll.u32 %s159_s20, 4  ;;  %s156_s30 = scalar_lea.sflag [#allocation9], %s867_s25  ;;  %s936_s28 = int_to_ptr.vmem [resolvable:$true] %s167_s28 }
  0x34   : > { %p930_p12 = pnand %p1093_p11, %p175_p9  ;;  %s663_s4 = scalar_lea.hbm %s926_s18, 128 }
  0x35   : > { %p664_p1 = scmp.ne.s32.totalorder %s926_s18, %s663_s4  ;;  %s668_s29 = scalar_lea.hbm %s1084_s1, 256 }
  0x36   : > { %p669_p2 = scmp.lt.u32.totalorder %s926_s18, %s1084_s1  ;;  %p670_p5 = scmp.lt.u32.totalorder %s668_s29, %s663_s4 }
  0x37   : > { %p666_p6 = pnand %p664_p1, %p635_p3  ;;  %p672_p7 = scmp.lt.u32.totalorder %s663_s4, %s926_s18 }
  0x38   : > { %p671_p4 = por %p670_p5, %p669_p2 }
  0x39   : > { %p667_p13 = pneg %p666_p6 }
  0x3a   : > { %p673_p10 = por %p672_p7, %p671_p4 }
  0x3c   : > { %p674_p9 = pnand %p673_p10, %p667_p13 }
  0x3e   : > { %677 = shalt.err (!%p674_p9)
}
  0x3f   : > { %s678_s26 = scalar_lea.vmem %s936_s28, 128  ;;  %s784_s16 = smov [#allocation8]  }
  0x40   : > { %p679_p11 = scmp.ne.s32.totalorder %s936_s28, %s678_s26  ;;  %s683_s20 = sshll.u32 %s784_s16, 4  ;;  %s684_s20 = int_to_ptr.vmem [resolvable:$false] %s683_s20 }
  0x41   : > { %s685_s27 = scalar_lea.vmem %s684_s20, 256  ;;  %p686_p8 = scmp.lt.s32.totalorder %s936_s28, %s684_s20 }
  0x42   : > { %p681_p1 = pnand %p679_p11, %p635_p3  ;;  %p687_p2 = scmp.lt.s32.totalorder %s685_s27, %s678_s26 }
  0x44   : > { %p682_p6 = pneg %p681_p1  ;;  %p688_p5 = por %p687_p2, %p686_p8 }
  0x46   : > { %p689_p4 = pnand %p688_p5, %p682_p6 }
  0x48   : > { %692 = shalt.err (!%p689_p4)
}
  0x49   : > { %571 = dma.hbm_to_vmem [thread:$0]  (!%p884_p0), %s926_s18, 128, %s936_s28, %s156_s30, %s782_s7, %s782_s7, %s783_s8  }
  0x4a   : > { %179 = sbr.rel (%p930_p12) target bundleno = 563 (0x233), region = 28  ;;  %s970_s4 = sand.u32 (!%p930_p12), 1, %s763_s10  }
  0x4b   : > { %s973_s6 = sshll.u32 (!%p930_p12), %s970_s4, 3  ;;  %s182_s5 = scalar_lea.sflag (!%p930_p12), [#allocation6], %s970_s4 }
  0x4c   : > { %s977_s29 = scalar_lea.vmem (!%p930_p12), [#allocation5], %s973_s6  ;;  %p1095_p8 = scmp.ne.s32.totalorder (!%p930_p12), %s1089_s21, 0 }
  0x51   : > { %746 = dma.done.wait (%p1095_p8), %s182_s5, 128  }
  0x52   : > { %748 = vsyncadd (%p1095_p8), %s182_s5, 4294967168  ;;  %s191_s25 = scalar_lea.sflag [#allocation9], %s970_s4  ;;  %s194_s7 = scalar_lea.vmem [#allocation8], %s973_s6 }
  0x53   : > { %750 = dma.done.wait (%p1095_p8), %s191_s25, 128  }
  0x54   : > { %752 = vsyncadd (%p1095_p8), %s191_s25, 4294967168  ;;  %v785_v0 = vmov 0.0   ;;  %vm236_vm0 = vcmask 1041408   ;;  %v231_v1 = vld [vmem:[%s194_s7] sm:$0x3]  ;;  %vm269_vm1 = vcmask 1041409  }
  0x55   : > { %224 = vst [vmem:[#allocation2] sm:$0xf] %v785_v0  ;;  %225 = vst [vmem:[#allocation3] sm:$0xf] %v785_v0  ;;  %v989_v2 = vld [vmem:[%s194_s7 + $0x2] sm:$0x3] }
  0x56   : > { %226 = vst [vmem:[#allocation4] sm:$0xf] %v785_v0  ;;  %v991_v3 = vld [vmem:[%s194_s7 + $0x4] sm:$0x3]  ;;  %v993_v4 = vld [vmem:[%s194_s7 + $0x6] sm:$0x3] }
  0x57   : > { %v237_v5 = vsel %vm236_vm0, %v231_v1, 0.0  ;;  %v244_v6 = vsel %vm236_vm0, %v989_v2, 0.0  ;;  %v251_v9 = vsel %vm236_vm0, %v991_v3, 0.0  ;;  %v258_v10 = vsel %vm236_vm0, %v993_v4, 0.0  ;;  %v227_v11 = vld [vmem:[%s977_s29] sm:$0x3] }
  0x58   : > { %v238_v7 = vrot.slane %v237_v5, 4  ;;  %v245_v8 = vrot.slane %v244_v6, 4  ;;  %v252_v12 = vrot.slane %v251_v9, 4  ;;  %v259_v13 = vrot.slane %v258_v10, 4  ;;  %v228_v14 = vld [vmem:[%s977_s29 + $0x2] sm:$0x3] }
  0x59   : > { %v229_v15 = vld [vmem:[%s977_s29 + $0x4] sm:$0x3]  ;;  %v318_v16 = vmul.f32 %v231_v1, %v227_v11  ;;  %vm271_vm2 = vcmask 1042434   ;;  %v230_v19 = vld [vmem:[%s977_s29 + $0x6] sm:$0x3]  ;;  %v279_v20 = vsel %vm236_vm0, %v227_v11, 0.0  ;;  %v319_v62 = vmul.f32 %v989_v2, %v228_v14 }
  0x5a   : > { %v239_v17 = vadd.f32 %v238_v7, %v237_v5  ;;  %v246_v18 = vadd.f32 %v245_v8, %v244_v6  ;;  %v286_v21 = vsel %vm236_vm0, %v228_v14, 0.0  ;;  %v253_v22 = vadd.f32 %v252_v12, %v251_v9  ;;  %s548_s3 = sshll.u32 %s771_s12, 7  ;;  %s219_s26 = scalar_lea.vmem [#allocation10], %s973_s6 }
  0x5b   : > { %v260_v23 = vadd.f32 %v259_v13, %v258_v10  ;;  %vm273_vm3 = vcmask 1043459   ;;  %v280_v24 = vrot.slane %v279_v20, 4  ;;  %v287_v25 = vrot.slane %v286_v21, 4  ;;  %s428_s16 = sshll.u32 %s219_s26, 4  ;;  %s1034_s29 = scalar_lea.hbm %s1085_s2, %s548_s3  ;;  %s1036_s16 = int_to_ptr.vmem [resolvable:$true] %s428_s16 }
  0x5c   : > { %v240_v26 = vrot.slane %v239_v17, 2  ;;  %v247_v27 = vrot.slane %v246_v18, 2  ;;  %v293_v28 = vsel %vm236_vm0, %v229_v15, 0.0  ;;  %v300_v29 = vsel %vm236_vm0, %v230_v19, 0.0  ;;  %v235_v58 = vld [vmem:[#allocation2] sm:$0xf] }
  0x5d   : > { %v254_v30 = vrot.slane %v253_v22, 2  ;;  %v261_v31 = vrot.slane %v260_v23, 2  ;;  %v281_v32 = vadd.f32 %v280_v24, %v279_v20  ;;  %v288_v33 = vadd.f32 %v287_v25, %v286_v21  ;;  %v278_v20 = vld [vmem:[#allocation3] sm:$0xf]  ;;  %s415_s25 = scalar_lea.sflag [#allocation7], %s970_s4  ;;  %s693_s7 = scalar_lea.vmem %s1036_s16, 128 }
  0x5e   : > { %v241_v34 = vadd.f32 %v240_v26, %v239_v17  ;;  %v248_v35 = vadd.f32 %v247_v27, %v246_v18  ;;  %v294_v36 = vrot.slane %v293_v28, 4  ;;  %v301_v37 = vrot.slane %v300_v29, 4  ;;  %p694_p0 = scmp.ne.s32.totalorder %s1036_s16, %s693_s7  ;;  %p1096_p3 = scmp.ne.s32.totalorder %s1090_s22, 0 }
  0x5f   : > { %v255_v38 = vadd.f32 %v254_v30, %v253_v22  ;;  %v262_v39 = vadd.f32 %v261_v31, %v260_v23  ;;  %v282_v40 = vrot.slane %v281_v32, 2  ;;  %v289_v41 = vrot.slane %v288_v33, 2  ;;  %s786_s12 = smov [#allocation10]  }
  0x60   : > { %v242_v42 = vrot.slane %v241_v34, 1  ;;  %v249_v43 = vrot.slane %v248_v35, 1  ;;  %v295_v44 = vadd.f32 %v294_v36, %v293_v28  ;;  %v302_v45 = vadd.f32 %v301_v37, %v300_v29  ;;  %p695_p12 = pnand %p694_p0, %p1096_p3  ;;  %s697_s6 = sshll.u32 %s786_s12, 4  ;;  %s698_s6 = int_to_ptr.vmem [resolvable:$false] %s697_s6 }
  0x61   : > { %v256_v46 = vrot.slane %v255_v38, 1  ;;  %v263_v47 = vrot.slane %v262_v39, 1  ;;  %v283_v48 = vadd.f32 %v282_v40, %v281_v32  ;;  %v290_v49 = vadd.f32 %v289_v41, %v288_v33  ;;  %p700_p7 = scmp.lt.s32.totalorder %s1036_s16, %s698_s6 }
  0x62   : > { %v243_v50 = vadd.f32 %v242_v42, %v241_v34  ;;  %v250_v51 = vadd.f32 %v249_v43, %v248_v35  ;;  %v296_v52 = vrot.slane %v295_v44, 2  ;;  %v303_v53 = vrot.slane %v302_v45, 2  ;;  %p696_p13 = pneg %p695_p12 }
  0x63   : > { %v257_v54 = vadd.f32 %v256_v46, %v255_v38  ;;  %v264_v55 = vadd.f32 %v263_v47, %v262_v39  ;;  %v284_v56 = vrot.slane %v283_v48, 1  ;;  %v291_v57 = vrot.slane %v290_v49, 1  ;;  %v317_v46 = vld [vmem:[#allocation4] sm:$0xf] }
  0x64   : > { %v270_v59 = vsel %vm269_vm1, %v250_v51, %v243_v50  ;;  %v297_v60 = vadd.f32 %v296_v52, %v295_v44  ;;  %v304_v61 = vadd.f32 %v303_v53, %v302_v45  ;;  %v320_v5 = vmul.f32 %v991_v3, %v229_v15 }
  0x65   : > { %v272_v63 = vsel %vm271_vm2, %v257_v54, %v270_v59  ;;  %v285_v0 = vadd.f32 %v284_v56, %v283_v48  ;;  %v292_v1 = vadd.f32 %v291_v57, %v290_v49  ;;  %v321_v9 = vmul.f32 %v993_v4, %v230_v19 }
  0x66   : > { %v274_v6 = vsel %vm273_vm3, %v264_v55, %v272_v63  ;;  %v298_v7 = vrot.slane %v297_v60, 1  ;;  %v305_v8 = vrot.slane %v304_v61, 1  ;;  %v322_v12 = vsel %vm236_vm0, %v318_v16, 0.0 }
  0x67   : > { %v276_v10 = vadd.f32 %v274_v6, %v235_v58  ;;  %v311_v11 = vsel %vm269_vm1, %v292_v1, %v285_v0  ;;  %v329_v13 = vsel %vm236_vm0, %v319_v62, 0.0  ;;  %v323_v17 = vrot.slane %v322_v12, 4 }
  0x68   : > { %v299_v2 = vadd.f32 %v298_v7, %v297_v60  ;;  %v306_v14 = vadd.f32 %v305_v8, %v304_v61  ;;  %v330_v18 = vrot.slane %v329_v13, 4  ;;  %v336_v3 = vsel %vm236_vm0, %v320_v5, 0.0 }
  0x69   : > { %277 = vst [vmem:[#allocation2] sm:$0xf] %v276_v10  ;;  %v343_v15 = vsel %vm236_vm0, %v321_v9, 0.0  ;;  %v324_v4 = vadd.f32 %v323_v17, %v322_v12  ;;  %v337_v22 = vrot.slane %v336_v3, 4  ;;  %vm364_vm4 = vcmask 1043456  }
  0x6a   : > { %v312_v21 = vsel %vm271_vm2, %v299_v2, %v311_v11  ;;  %v331_v19 = vadd.f32 %v330_v18, %v329_v13  ;;  %v344_v16 = vrot.slane %v343_v15, 4  ;;  %vm381_vm5 = vcmask 3072  }
  0x6b   : > { %v313_v23 = vsel %vm273_vm3, %v306_v14, %v312_v21  ;;  %v325_v25 = vrot.slane %v324_v4, 2  ;;  %v338_v27 = vadd.f32 %v337_v22, %v336_v3 }
  0x6c   : > { %v315_v24 = vadd.f32 %v313_v23, %v278_v20  ;;  %v332_v26 = vrot.slane %v331_v19, 2  ;;  %v345_v28 = vadd.f32 %v344_v16, %v343_v15 }
  0x6d   : > { %v326_v29 = vadd.f32 %v325_v25, %v324_v4  ;;  %v339_v31 = vrot.slane %v338_v27, 2 }
  0x6e   : > { %316 = vst [vmem:[#allocation3] sm:$0xf] %v315_v24  ;;  %v333_v30 = vadd.f32 %v332_v26, %v331_v19  ;;  %v346_v32 = vrot.slane %v345_v28, 2 }
  0x6f   : > { %v327_v34 = vrot.slane %v326_v29, 1  ;;  %v340_v36 = vadd.f32 %v339_v31, %v338_v27 }
  0x70   : > { %v363_v33 = vld [vmem:[#allocation2] sm:$0xf]  ;;  %v334_v35 = vrot.slane %v333_v30, 1  ;;  %v347_v38 = vadd.f32 %v346_v32, %v345_v28 }
  0x71   : > { %v365_v37 = vsel %vm364_vm4, %v363_v33, 0.0  ;;  %v328_v39 = vadd.f32 %v327_v34, %v326_v29  ;;  %v341_v41 = vrot.slane %v340_v36, 1 }
  0x72   : > { %366 = vadd.xlane.f32.xlu0 %v365_v37  ;;  %v335_v40 = vadd.f32 %v334_v35, %v333_v30  ;;  %v348_v42 = vrot.slane %v347_v38, 1 }
  0x73   : > { %v342_v43 = vadd.f32 %v341_v41, %v340_v36 }
  0x74   : > { %v354_v44 = vsel %vm269_vm1, %v335_v40, %v328_v39  ;;  %v349_v47 = vadd.f32 %v348_v42, %v347_v38 }
  0x75   : > { %v368_v45 = vld [vmem:[#allocation3] sm:$0xf]  ;;  %v355_v49 = vsel %vm271_vm2, %v342_v43, %v354_v44 }
  0x76   : > { %v369_v48 = vsel %vm364_vm4, %v368_v45, 0.0  ;;  %v356_v50 = vsel %vm273_vm3, %v349_v47, %v355_v49 }
  0x77   : > { %370 = vadd.xlane.f32.xlu0 %v369_v48  ;;  %v358_v51 = vadd.f32 %v356_v50, %v317_v46 }
  0x79   : > { %359 = vst [vmem:[#allocation4] sm:$0xf] %v358_v51 }
  0x80   : > { %v372_v52 = vld [vmem:[#allocation4] sm:$0xf] }
  0x81   : > { %v373_v53 = vsel %vm364_vm4, %v372_v52, 0.0 }
  0x82   : > { %374 = vadd.xlane.f32.xlu1 %v373_v53 }
  0xff   : > { %v367_v54 = vpop.xlane.xlu0 %366 }
 0x100   : > { %v376_v55 = vadd.f32 1e-10, %v367_v54 }
 0x102   : > { %v377_v56 = vmul.f32 %v376_v55, %v376_v55 }
 0x104   : > { %629 = vrcp.f32 %v377_v56  ;;  %v371_v57 = vpop.xlane.xlu0 %370 }
 0x105   : > { %v393_v58 = vadd.f32 %v371_v57, %v367_v54 }
 0x10e   : > { %v630_v59 = vpop.eup %629 }
 0x10f   : > { %v394_v60 = vmul.f32 %v630_v59, %v393_v58  ;;  %v375_v61 = vpop.xlane.xlu1 %374 }
 0x110   : > { %v380_v62 = vmul.f32 %v630_v59, %v375_v61 }
 0x111   : > { %v395_v63 = vsel %vm381_vm5, %v394_v60, 0.0 }
 0x112   : > { %396 = vadd.xlane.f32.xlu0 %v395_v63  ;;  %v382_v0 = vsel %vm381_vm5, %v380_v62, 0.0 }
 0x113   : > { %383 = vadd.xlane.f32.xlu1 %v382_v0 }
 0x19f   : > { %v397_v1 = vpop.xlane.xlu0 %396 }
 0x1a0   : > { %v398_v5 = vrot.slane %v397_v1, 4  ;;  %v384_v6 = vpop.xlane.xlu1 %383 }
 0x1a1   : > { %v385_v7 = vrot.slane %v384_v6, 4 }
 0x1a2   : > { %v399_v8 = vadd.f32 %v398_v5, %v397_v1 }
 0x1a3   : > { %v386_v9 = vadd.f32 %v385_v7, %v384_v6 }
 0x1a4   : > { %v400_v10 = vrot.slane %v399_v8, 2 }
 0x1a5   : > { %v387_v11 = vrot.slane %v386_v9, 2 }
 0x1a6   : > { %v401_v12 = vadd.f32 %v400_v10, %v399_v8 }
 0x1a7   : > { %v388_v13 = vadd.f32 %v387_v11, %v386_v9 }
 0x1a8   : > { %v402_v2 = vrot.slane %v401_v12, 1 }
 0x1a9   : > { %v389_v14 = vrot.slane %v388_v13, 1 }
 0x1aa   : > { %v403_v17 = vadd.f32 %v402_v2, %v401_v12 }
 0x1ab   : > { %v390_v18 = vadd.f32 %v389_v14, %v388_v13 }
 0x1ad   : > { %553 = vpush %v390_v18 }
 0x1ae   : > { %555 = vpush %v403_v17 }
 0x1de   : > { %s554_s21 = spop %553 }
 0x1df   : > { %s556_s8 = spop %555  ;;  %s392_s19 = sadd.f32 1e-05, %s554_s21 }
 0x1e0   : > { %s405_s18 = sadd.f32 1e-05, %s556_s8  ;;  %s699_s21 = scalar_lea.vmem %s698_s6, 256 }
 0x1e1   : > { %s406_s28 = smul.f32 2.0, %s392_s19  ;;  %p701_p10 = scmp.lt.s32.totalorder %s699_s21, %s693_s7 }
 0x1e2   : > { %v407_v20 = vstv %s405_s18 }
 0x1e3   : > { %631 = vrcp.f32 %v407_v20  ;;  %p702_p9 = por %p701_p10, %p700_p7 }
 0x1e5   : > { %p703_p11 = pnand %p702_p9, %p696_p13 }
 0x1ed   : > { %v632_v3 = vpop.eup %631 }
 0x1ee   : > { %557 = vpush %v632_v3 }
 0x21f   : > { %s558_s30 = spop %557 }
 0x220   : > { %s410_s15 = smul.f32 %s558_s30, %s406_s28 }
 0x222   : > { %s411_s20 = ssub.f32 1.0, %s410_s15 }
 0x224   : > { %v412_v15 = vstv %s411_s20 }
 0x225   : > { %413 = vst [vmem:[%s219_s26] sm:$0xff] %v412_v15 }
 0x226   : > { %706 = shalt.err (!%p703_p11)
}
 0x227   : > { %s707_s4 = scalar_lea.hbm %s1034_s29, 128  ;;  %s711_s19 = scalar_lea.hbm %s1085_s2, 256 }
 0x228   : > { %p708_p1 = scmp.ne.s32.totalorder %s1034_s29, %s707_s4  ;;  %p712_p5 = scmp.lt.u32.totalorder %s1034_s29, %s1085_s2 }
 0x229   : > { %p713_p4 = scmp.lt.u32.totalorder %s711_s19, %s707_s4  ;;  %p715_p0 = scmp.lt.u32.totalorder %s707_s4, %s1034_s29 }
 0x22a   : > { %p709_p6 = pnand %p708_p1, %p1096_p3 }
 0x22b   : > { %p714_p8 = por %p713_p4, %p712_p5 }
 0x22c   : > { %p710_p2 = pneg %p709_p6 }
 0x22d   : > { %p716_p12 = por %p715_p0, %p714_p8 }
 0x22f   : > { %p717_p13 = pnand %p716_p12, %p710_p2 }
 0x231   : > { %720 = shalt.err (!%p717_p13)
}
 0x232   : > { %563 = dma.vmem_to_hbm [thread:$0]  (%p1096_p3), %s1036_s16, 128, %s1034_s29, %s415_s25  }
 0x233 PF: > { %s440_s3 = sand.u32 1, %s759_s9   ;;  %p1097_p7 = scmp.ne.s32.totalorder %s1091_s24, 0 }
 0x234   : > { %p1098_p10 = scmp.ge.s32.totalorder %s779_s14, 2  ;;  %s441_s15 = scalar_lea.sflag [#allocation7], %s440_s3 }
 0x236   : > { %p573_p9 = pnand %p1098_p10, %p1097_p7 }
 0x238   : > { %754 = dma.done.wait (!%p573_p9), %s441_s15, 128  }
 0x239   : > { %756 = vsyncadd (!%p573_p9), %s441_s15, 4294967168  ;;  %s21_s14 = sadd.s32 1, %s779_s14   ;;  %s1099_s9 = smov %s763_s10 }
 0x23a   : > { %p18_p11 = scmp.ge.s32.totalorder %s21_s14, 4   ;;  %s1100_s10 = smov %s767_s11 }
 0x23b   : > { %s1101_s11 = smov %s858_s23  ;;  %s1102_s12 = smov %s775_s13 }
 0x23c   : > { %s1103_s13 = smov %s1105_s17  ;;  %20 = sbr.rel (!%p18_p11) target bundleno = 8 (0x8), region = 94 }
 0x243   :  { %446 = vsyncpa [#allocation6], 1 }
 0x244   :  { %448 = vsyncpa [#allocation6 + $0x1], 1 }
 0x245   :  { %449 = vsyncpa [#allocation9], 1 }
 0x246   :  { %451 = vsyncpa [#allocation9 + $0x1], 1 }
 0x247   :  { %452 = vsyncpa [#allocation7], 1 }
 0x248   :  { %454 = vsyncpa [#allocation7 + $0x1], 1 }

</bundles_post_ra>
